<compile_context>
chip_gen: v7x
topology: tpu7x:2x2x1
jax: 0.10.0
libtpu: 0.0.40
codegen_flags: <defaults>
</compile_context>

<pallas_src>
import functools
import math

import jax
import jax.numpy as jnp
from jax.experimental import pallas as pl
from jax.experimental.pallas import tpu as pltpu


LANE = 128
_MAX_COL_TILE = 2048            # cap on streamed tile width (columns)
_VMEM_STREAM_BUDGET = 24 << 20  # bytes for double-buffered streamed tiles


def _sigmoid_eup(x):
    # 0.5*(tanh(0.5x)+1): tanh runs on the EUP slot (no VPU divide in the epilogue).
    return 0.5 * (jnp.tanh(0.5 * x) + 1.0)


_ACTIVATIONS = {
    "sigmoid": _sigmoid_eup,
    "tanh": jnp.tanh,
}


def _gate_kernel(w_ref, u_ref, b_ref, x_ref, h_ref, o_ref, *, act_fn):
    # Two MXU matmuls accumulated in f32, bias add on VPU, activation on EUP.
    pre = jnp.dot(w_ref[...], x_ref[...], preferred_element_type=jnp.float32)
    pre = pre + jnp.dot(u_ref[...], h_ref[...], preferred_element_type=jnp.float32)
    o_ref[...] = act_fn(pre + b_ref[...]).astype(o_ref.dtype)


def _col_padding(cols):
    """Pad per-sample width to a lane-friendly value.

    Returns (cols_p, lane_unit) with cols_p | lane_unit and 128 | lane_unit.
    """
    if cols % LANE == 0:
        cols_p = cols
    elif cols < LANE:
        cols_p = 1
        while cols_p < cols:   # next power of two (divides 128)
            cols_p *= 2
    else:
        cols_p = ((cols + LANE - 1) // LANE) * LANE
    lane_unit = max(LANE, cols_p)
    return cols_p, lane_unit


def _choose_col_tile(total_cols, lane_unit, k_rows, m_rows, in_bytes):
    """Largest lane_unit-multiple dividing total_cols that fits the VMEM budget."""
    # Double-buffered streamed bytes per output column: x + h (bf16) + out (f32).
    per_col = 2 * (2 * k_rows * in_bytes + m_rows * 4)
    cap = max(lane_unit, min(_MAX_COL_TILE, _VMEM_STREAM_BUDGET // per_col))
    best = lane_unit
    t = lane_unit
    while t <= total_cols and t <= cap:
        if total_cols % t == 0:
            best = t
        t += lane_unit
    # Prefer >=2 grid steps (pipelining, v7x megacore) when the halved tile is
    # still wide enough (>=512 cols) that per-step overhead stays amortized.
    if (best == total_cols and (total_cols // 2) % lane_unit == 0
            and total_cols // 2 >= 512):
        best = total_cols // 2
    return best


def mat_gru_gate_flat(W, U, bias, x_flat, h_flat, activation="sigmoid", *,
                      compute_dtype=jnp.bfloat16):
    """Core kernel call on pre-flattened activations.

    W, U       : (M, rows)
    bias       : (M, cols_p)            (per-sample bias, cols_p lane-friendly)
    x_flat, h_flat : (rows, total_cols) with total_cols % lcm(cols_p, 128) == 0
    Returns    : (M, total_cols)

    Keep activations in this layout across GRU timesteps so the transpose /
    reshape happens once per sequence, not once per gate call.
    """
    act_fn = _ACTIVATIONS[activation]
    M, k_rows = W.shape
    rows, total_cols = x_flat.shape
    assert k_rows == rows, "W must be (M, rows)"
    assert U.shape == (M, rows), "U must be (M, rows)"
    assert h_flat.shape == (rows, total_cols)
    cols_p = bias.shape[1]
    assert bias.shape == (M, cols_p)
    lane_unit = (cols_p * LANE) // math.gcd(cols_p, LANE)
    assert total_cols % lane_unit == 0, "total_cols must align with lcm(cols_p, 128)"

    in_bytes = jnp.dtype(compute_dtype).itemsize
    col_tile = _choose_col_tile(total_cols, lane_unit, rows, M, in_bytes)
    grid = (total_cols // col_tile,)

    # Streamed operands in bf16 (MXU-native); bias / accumulation stay f32.
    Wc = W.astype(compute_dtype)
    Uc = U.astype(compute_dtype)
    xc = x_flat.astype(compute_dtype)
    hc = h_flat.astype(compute_dtype)
    # Only a tile-width bias is materialized; it stays VMEM-resident.
    bias_tile = jnp.tile(bias.astype(jnp.float32), (1, col_tile // cols_p))

    # VMEM footprint: double-buffered W/U + resident bias tile + streamed x/h/out.
    footprint = (4 * M * rows * in_bytes
                 + 2 * M * col_tile * 4
                 + 2 * col_tile * (2 * rows * in_bytes + M * 4))
    vmem_limit = int(min(48 << 20, max(16 << 20, footprint + (2 << 20))))

    flops = 4 * M * rows * total_cols + 2 * M * total_cols
    bytes_accessed = int(in_bytes * (Wc.size + Uc.size + xc.size + hc.size)
                         + 4 * (bias_tile.size + M * total_cols))

    out_dtype = x_flat.dtype

    return pl.pallas_call(
        functools.partial(_gate_kernel, act_fn=act_fn),
        out_shape=jax.ShapeDtypeStruct((M, total_cols), out_dtype),
        grid=grid,
        in_specs=[
            pl.BlockSpec((M, rows), lambda j: (0, 0)),        # W  (VMEM-resident)
            pl.BlockSpec((M, rows), lambda j: (0, 0)),        # U  (VMEM-resident)
            pl.BlockSpec((M, col_tile), lambda j: (0, 0)),    # bias tile (resident)
            pl.BlockSpec((rows, col_tile), lambda j: (0, j)), # x  (streamed)
            pl.BlockSpec((rows, col_tile), lambda j: (0, j)), # h  (streamed)
        ],
        out_specs=pl.BlockSpec((M, col_tile), lambda j: (0, j)),
        compiler_params=pltpu.CompilerParams(
            dimension_semantics=("parallel",),
            vmem_limit_bytes=vmem_limit),
        cost_estimate=pl.CostEstimate(
            flops=flops,
            transcendentals=M * total_cols,
            bytes_accessed=bytes_accessed),
    )(Wc, Uc, bias_tile, xc, hc)


def mat_gru_gate(W, U, bias, x, hidden, activation="sigmoid", *,
                 compute_dtype=jnp.bfloat16):
    """activation(W @ x + U @ hidden + bias).

    x / hidden: a single sample (rows, cols) or a batch (B, rows, cols) of
    samples sharing W, U, bias.  Samples are laid side-by-side on the TPU lane
    axis so the output stores are lane-dense.
    """
    batched = x.ndim == 3
    if not batched:
        x = x[None]
        hidden = hidden[None]
    B, rows, cols = x.shape
    M = W.shape[0]
    assert W.shape == (M, rows)
    assert U.shape == (M, rows)
    assert bias.shape == (M, cols)
    assert hidden.shape == (B, rows, cols)

    cols_p, lane_unit = _col_padding(cols)
    samples_per_unit = lane_unit // cols_p
    B_p = ((B + samples_per_unit - 1) // samples_per_unit) * samples_per_unit

    pad_c = cols_p - cols
    pad_b = B_p - B
    if pad_c or pad_b:
        x = jnp.pad(x, ((0, pad_b), (0, 0), (0, pad_c)))
        hidden = jnp.pad(hidden, ((0, pad_b), (0, 0), (0, pad_c)))
    bias_p = jnp.pad(bias, ((0, 0), (0, pad_c))) if pad_c else bias

    # (B_p, rows, cols_p) -> (rows, B_p*cols_p): samples side-by-side on lanes.
    x_flat = jnp.transpose(x, (1, 0, 2)).reshape(rows, B_p * cols_p)
    h_flat = jnp.transpose(hidden, (1, 0, 2)).reshape(rows, B_p * cols_p)

    out_flat = mat_gru_gate_flat(W, U, bias_p, x_flat, h_flat, activation,
                                 compute_dtype=compute_dtype)

    out = out_flat.reshape(M, B_p, cols_p).transpose(1, 0, 2)[:B, :, :cols]
    return out if batched else out[0]


def mat_gru_gates_fused(gates, x, hidden, activation="sigmoid", *,
                        compute_dtype=jnp.bfloat16):
    """Fuse gates that share (x, hidden) and the activation (e.g. update + reset).

    gates: sequence of (W, U, bias) with identical shapes; weights are stacked
    along M so one pallas_call streams x/h once for all gates.
    Returns a tuple of per-gate outputs.
    """
    Ws, Us, bs = zip(*gates)
    rows = Ws[0].shape[0]
    W = jnp.concatenate(Ws, axis=0)
    U = jnp.concatenate(Us, axis=0)
    bias = jnp.concatenate(bs, axis=0)
    out = mat_gru_gate(W, U, bias, x, hidden, activation,
                       compute_dtype=compute_dtype)
    if out.ndim == 3:
        return tuple(out[:, i * rows:(i + 1) * rows, :] for i in range(len(gates)))
    return tuple(out[i * rows:(i + 1) * rows, :] for i in range(len(gates)))


def init_params(key, rows, cols):
    """Deterministic re-implementation of reset_param: uniform(-stdv, stdv)."""
    stdv = 1.0 / math.sqrt(rows)  # t.size(1) == rows for both W and U
    kw, ku = jax.random.split(key)
    W = jax.random.uniform(kw, (rows, rows), jnp.float32, -stdv, stdv)
    U = jax.random.uniform(ku, (rows, rows), jnp.float32, -stdv, stdv)
    bias = jnp.zeros((rows, cols), jnp.float32)
    return W, U, bias


if __name__ == "__main__":
    rows, cols, B = 32, 16, 8   # B*cols = 128 -> lane-dense output blocks

    key = jax.random.PRNGKey(0)
    k1, k2, k3, k4 = jax.random.split(key, 4)

    W, U, bias = init_params(k1, rows, cols)       # "update"-style gate params
    W2, U2, bias2 = init_params(k2, rows, cols)    # "reset"-style gate params
    x = jax.random.normal(k3, (B, rows, cols), jnp.float32)
    hidden = jax.random.normal(k4, (B, rows, cols), jnp.float32)

    # Batched sigmoid / tanh gates, single-sample path, and fused update+reset.
    out_sig = jax.block_until_ready(mat_gru_gate(W, U, bias, x, hidden, "sigmoid"))
    out_tanh = jax.block_until_ready(mat_gru_gate(W, U, bias, x, hidden, "tanh"))
    out_one = jax.block_until_ready(mat_gru_gate(W, U, bias, x[0], hidden[0]))
    out_u, out_r = mat_gru_gates_fused([(W, U, bias), (W2, U2, bias2)],
                                       x, hidden, "sigmoid")
    out_u = jax.block_until_ready(out_u)
    out_r = jax.block_until_ready(out_r)

    # Pure-JAX f32 reference.
    pre1 = (jnp.einsum("rk,bkc->brc", W, x)
            + jnp.einsum("rk,bkc->brc", U, hidden) + bias)
    pre2 = (jnp.einsum("rk,bkc->brc", W2, x)
            + jnp.einsum("rk,bkc->brc", U2, hidden) + bias2)
    ref_sig = jax.nn.sigmoid(pre1)
    ref_tanh = jnp.tanh(pre1)
    ref_sig2 = jax.nn.sigmoid(pre2)

    # Streamed operands are bf16 (f32 accumulation) -> compare at 1e-2.
    tol = dict(atol=1e-2, rtol=1e-2)
    assert out_sig.shape == (B, rows, cols)
    assert jnp.allclose(out_sig, ref_sig, **tol), "sigmoid mismatch"
    assert jnp.allclose(out_tanh, ref_tanh, **tol), "tanh mismatch"
    assert out_one.shape == (rows, cols)
    assert jnp.allclose(out_one, ref_sig[0], **tol), "single-sample mismatch"
    assert out_u.shape == (B, rows, cols) and out_r.shape == (B, rows, cols)
    assert jnp.allclose(out_u, ref_sig, **tol), "fused update-gate mismatch"
    assert jnp.allclose(out_r, ref_sig2, **tol), "fused reset-gate mismatch"

    print("KERNEL_OK")
</pallas_src>

<mosaic_0001>
module attributes {stable_mosaic.version = 11 : i64} {
  func.func @_gate_kernel(%arg0: i32, %arg1: memref<32x32xbf16, #tpu.memory_space<vmem>>, %arg2: memref<32x32xbf16, #tpu.memory_space<vmem>>, %arg3: memref<32x128xf32, #tpu.memory_space<vmem>>, %arg4: memref<32x128xbf16, #tpu.memory_space<vmem>>, %arg5: memref<32x128xbf16, #tpu.memory_space<vmem>>, %arg6: memref<32x128xf32, #tpu.memory_space<vmem>>) attributes {dimension_semantics = [#tpu.dimension_semantics<parallel>], iteration_bounds = array<i64: 1>, scalar_prefetch = 0 : i64, scratch_operands = 0 : i64, tpu.core_type = #tpu.core_type<tc>, window_params = [{pipeline_mode = #tpu.pipeline_mode<synchronous>, transform_indices = @transform_0, window_bounds = array<i64: 32, 32>}, {pipeline_mode = #tpu.pipeline_mode<synchronous>, transform_indices = @transform_1, window_bounds = array<i64: 32, 32>}, {pipeline_mode = #tpu.pipeline_mode<synchronous>, transform_indices = @transform_2, window_bounds = array<i64: 32, 128>}, {transform_indices = @transform_3, window_bounds = array<i64: 32, 128>}, {transform_indices = @transform_4, window_bounds = array<i64: 32, 128>}, {transform_indices = @transform_5, window_bounds = array<i64: 32, 128>}]} {
    %c0 = arith.constant 0 : index
    %c0_0 = arith.constant 0 : index
    %0 = vector.load %arg1[%c0, %c0_0] : memref<32x32xbf16, #tpu.memory_space<vmem>>, vector<32x32xbf16>
    %c0_1 = arith.constant 0 : index
    %c0_2 = arith.constant 0 : index
    %1 = vector.load %arg4[%c0_1, %c0_2] : memref<32x128xbf16, #tpu.memory_space<vmem>>, vector<32x128xbf16>
    %cst = arith.constant dense<0.000000e+00> : vector<32x128xf32>
    %2 = tpu.matmul %0, %1, %cst {dimension_numbers = #tpu.dot_dimension_numbers<[1], [0], [0], [1], [0, 0, 1, 1], [], []>} : vector<32x32xbf16>, vector<32x128xbf16>, vector<32x128xf32> -> vector<32x128xf32>
    %c0_3 = arith.constant 0 : index
    %c0_4 = arith.constant 0 : index
    %3 = vector.load %arg2[%c0_3, %c0_4] : memref<32x32xbf16, #tpu.memory_space<vmem>>, vector<32x32xbf16>
    %c0_5 = arith.constant 0 : index
    %c0_6 = arith.constant 0 : index
    %4 = vector.load %arg5[%c0_5, %c0_6] : memref<32x128xbf16, #tpu.memory_space<vmem>>, vector<32x128xbf16>
    %cst_7 = arith.constant dense<0.000000e+00> : vector<32x128xf32>
    %5 = tpu.matmul %3, %4, %cst_7 {dimension_numbers = #tpu.dot_dimension_numbers<[1], [0], [0], [1], [0, 0, 1, 1], [], []>} : vector<32x32xbf16>, vector<32x128xbf16>, vector<32x128xf32> -> vector<32x128xf32>
    %6 = arith.addf %2, %5 : vector<32x128xf32>
    %c0_8 = arith.constant 0 : index
    %c0_9 = arith.constant 0 : index
    %7 = vector.load %arg3[%c0_8, %c0_9] : memref<32x128xf32, #tpu.memory_space<vmem>>, vector<32x128xf32>
    %8 = arith.addf %6, %7 : vector<32x128xf32>
    %cst_10 = arith.constant 5.000000e-01 : f32
    %9 = vector.broadcast %cst_10 : f32 to vector<32x128xf32>
    %10 = arith.mulf %9, %8 : vector<32x128xf32>
    %11 = math.tanh %10 : vector<32x128xf32>
    %cst_11 = arith.constant 1.000000e+00 : f32
    %12 = vector.broadcast %cst_11 : f32 to vector<32x128xf32>
    %13 = arith.addf %11, %12 : vector<32x128xf32>
    %cst_12 = arith.constant 5.000000e-01 : f32
    %14 = vector.broadcast %cst_12 : f32 to vector<32x128xf32>
    %15 = arith.mulf %14, %13 : vector<32x128xf32>
    %c0_13 = arith.constant 0 : index
    %c0_14 = arith.constant 0 : index
    %16 = vector.load %arg6[%c0_13, %c0_14] : memref<32x128xf32, #tpu.memory_space<vmem>>, vector<32x128xf32>
    tpu.vector_store %arg6[%c0_13, %c0_14], %15 {strides = array<i32>} : memref<32x128xf32, #tpu.memory_space<vmem>>, vector<32x128xf32>,
    return
  }
  func.func @transform_0(%arg0: i32) -> (i32, i32) {
    %c0_i32 = arith.constant 0 : i32
    %c0_i32_0 = arith.constant 0 : i32
    %c0_i32_1 = arith.constant 0 : i32
    return %c0_i32, %c0_i32_0 : i32, i32
  }
  func.func @transform_1(%arg0: i32) -> (i32, i32) {
    %c0_i32 = arith.constant 0 : i32
    %c0_i32_0 = arith.constant 0 : i32
    %c0_i32_1 = arith.constant 0 : i32
    return %c0_i32, %c0_i32_0 : i32, i32
  }
  func.func @transform_2(%arg0: i32) -> (i32, i32) {
    %c0_i32 = arith.constant 0 : i32
    %c0_i32_0 = arith.constant 0 : i32
    %c0_i32_1 = arith.constant 0 : i32
    return %c0_i32, %c0_i32_0 : i32, i32
  }
  func.func @transform_3(%arg0: i32) -> (i32, i32) {
    %c0_i32 = arith.constant 0 : i32
    %c0_i32_0 = arith.constant 0 : i32
    return %c0_i32, %arg0 : i32, i32
  }
  func.func @transform_4(%arg0: i32) -> (i32, i32) {
    %c0_i32 = arith.constant 0 : i32
    %c0_i32_0 = arith.constant 0 : i32
    return %c0_i32, %arg0 : i32, i32
  }
  func.func @transform_5(%arg0: i32) -> (i32, i32) {
    %c0_i32 = arith.constant 0 : i32
    %c0_i32_0 = arith.constant 0 : i32
    return %c0_i32, %arg0 : i32, i32
  }
}

</mosaic_0001>

<bundles_post_ra>
// kernel: tpu_custom_call.1
= control target key start
LH: loop header
LB: loop body
LE: loop exit
PB: predicated region body
PF: predicated region fallthrough
CT: control target
= control target key end

     0   :  { %10 = vsyncpa [#allocation3], 0  ;;  %s658_s0 = inlined_call_operand.hbm [shape: bf16[32,32], index: 0, kind: input, shape index: {}]   ;;  %s659_s1 = inlined_call_operand.hbm [shape: bf16[32,32], index: 1, kind: input, shape index: {}]   ;;  %s660_s2 = inlined_call_operand.hbm [shape: f32[32,128], index: 2, kind: input, shape index: {}]   ;;  %s661_s3 = inlined_call_operand.hbm [shape: bf16[32,128], index: 3, kind: input, shape index: {}]   ;;  %s662_s4 = inlined_call_operand.hbm [shape: bf16[32,128], index: 4, kind: input, shape index: {}]   ;;  %s663_s5 = inlined_call_operand.hbm [shape: f32[32,128], index: 5, kind: output, shape index: {}]  }
   0x1   :  { %11 = vsyncpa [#allocation6], 0 }
   0x2   :  { %12 = vsyncpa [#allocation9], 0 }
   0x3   :  { %13 = vsyncpa [#allocation4], 0  ;;  %s514_s18 = smov [#allocation5]   ;;  %s515_s20 = smov [#allocation8]  }
   0x4   :  { %s31_s19 = sshll.u32 %s514_s18, 4  ;;  %s55_s21 = sshll.u32 %s515_s20, 4  ;;  %s32_s19 = int_to_ptr.vmem [resolvable:$true] %s31_s19  ;;  %s554_s21 = int_to_ptr.vmem [resolvable:$true] %s55_s21 }
   0x5   :  { %s374_s24 = scalar_lea.hbm %s659_s1, 256 }
   0x6   :  { %p375_p0 = scmp.ne.s32.totalorder %s659_s1, %s374_s24  ;;  %p378_p1 = scmp.lt.u32.totalorder %s374_s24, %s659_s1 }
   0x8   :  { %p380_p2 = pnand %p378_p1, %p375_p0 }
   0xa   :  { %383 = shalt.err (!%p380_p2)
}
   0xb   :  { %s384_s29 = scalar_lea.vmem %s32_s19, 256  ;;  %p389_p4 = scmp.lt.s32.totalorder %s32_s19, %s32_s19 }
   0xc   :  { %p385_p3 = scmp.ne.s32.totalorder %s32_s19, %s384_s29  ;;  %p390_p5 = scmp.lt.s32.totalorder %s384_s29, %s384_s29 }
   0xe   :  { %p391_p6 = por %p390_p5, %p389_p4 }
  0x10   :  { %p392_p7 = pnand %p391_p6, %p385_p3 }
  0x12   :  { %395 = shalt.err (!%p392_p7)
}
  0x13   :  { %s516_s30 = smov 64   ;;  %s517_s6 = smov 4  }
  0x14   :  { %37 = dma.hbm_to_vmem [thread:$0]  %s659_s1, 256, %s32_s19, [#allocation6], %s516_s30, %s516_s30, %s517_s6  }
  0x15   :  { %s396_s11 = scalar_lea.hbm %s661_s3, 256 }
  0x16   :  { %p397_p8 = scmp.ne.s32.totalorder %s661_s3, %s396_s11  ;;  %p400_p9 = scmp.lt.u32.totalorder %s396_s11, %s661_s3 }
  0x18   :  { %p402_p10 = pnand %p400_p9, %p397_p8 }
  0x1a   :  { %405 = shalt.err (!%p402_p10)
}
  0x1b   :  { %s406_s16 = scalar_lea.vmem %s554_s21, 256  ;;  %p411_p12 = scmp.lt.s32.totalorder %s554_s21, %s554_s21 }
  0x1c   :  { %p407_p11 = scmp.ne.s32.totalorder %s554_s21, %s406_s16  ;;  %p412_p13 = scmp.lt.s32.totalorder %s406_s16, %s406_s16 }
  0x1e   :  { %p413_p0 = por %p412_p13, %p411_p12 }
  0x20   :  { %p414_p1 = pnand %p413_p0, %p407_p11 }
  0x22   :  { %417 = shalt.err (!%p414_p1)
}
  0x23   :  { %61 = dma.hbm_to_vmem [thread:$0]  %s661_s3, 256, %s554_s21, [#allocation9], %s516_s30, %s516_s30, %s517_s6  }
  0x24   :  { %s518_s18 = smov [#allocation2]   ;;  %s519_s20 = smov [#allocation7]  }
  0x25   :  { %s19_s19 = sshll.u32 %s518_s18, 4  ;;  %s43_s22 = sshll.u32 %s519_s20, 4  ;;  %s20_s19 = int_to_ptr.vmem [resolvable:$true] %s19_s19  ;;  %s591_s22 = int_to_ptr.vmem [resolvable:$true] %s43_s22 }
  0x26   :  { %s418_s25 = scalar_lea.hbm %s658_s0, 256 }
  0x27   :  { %p419_p2 = scmp.ne.s32.totalorder %s658_s0, %s418_s25  ;;  %p422_p3 = scmp.lt.u32.totalorder %s418_s25, %s658_s0 }
  0x29   :  { %p424_p4 = pnand %p422_p3, %p419_p2 }
  0x2b   :  { %427 = shalt.err (!%p424_p4)
}
  0x2c   :  { %s428_s3 = scalar_lea.vmem %s20_s19, 256  ;;  %p433_p6 = scmp.lt.s32.totalorder %s20_s19, %s20_s19 }
  0x2d   :  { %p429_p5 = scmp.ne.s32.totalorder %s20_s19, %s428_s3  ;;  %p434_p7 = scmp.lt.s32.totalorder %s428_s3, %s428_s3 }
  0x2f   :  { %p435_p8 = por %p434_p7, %p433_p6 }
  0x31   :  { %p436_p9 = pnand %p435_p8, %p429_p5 }
  0x33   :  { %439 = shalt.err (!%p436_p9)
}
  0x34   :  { %25 = dma.hbm_to_vmem [thread:$0]  %s658_s0, 256, %s20_s19, [#allocation3], %s516_s30, %s516_s30, %s517_s6  }
  0x35   :  { %s440_s10 = scalar_lea.hbm %s660_s2, 512 }
  0x36   :  { %p441_p10 = scmp.ne.s32.totalorder %s660_s2, %s440_s10  ;;  %p444_p11 = scmp.lt.u32.totalorder %s440_s10, %s660_s2 }
  0x38   :  { %p446_p12 = pnand %p444_p11, %p441_p10 }
  0x3a   :  { %449 = shalt.err (!%p446_p12)
}
  0x3b   :  { %s450_s15 = scalar_lea.vmem %s591_s22, 512  ;;  %p455_p0 = scmp.lt.s32.totalorder %s591_s22, %s591_s22 }
  0x3c   :  { %p451_p13 = scmp.ne.s32.totalorder %s591_s22, %s450_s15  ;;  %p456_p1 = scmp.lt.s32.totalorder %s450_s15, %s450_s15 }
  0x3e   :  { %p457_p2 = por %p456_p1, %p455_p0 }
  0x40   :  { %p458_p3 = pnand %p457_p2, %p451_p13 }
  0x42   :  { %461 = shalt.err (!%p458_p3)
}
  0x43   :  { %s520_s0 = smov 128   ;;  %s521_s16 = smov 8  }
  0x44   :  { %49 = dma.hbm_to_vmem [thread:$0]  %s660_s2, 512, %s591_s22, [#allocation6], %s520_s0, %s520_s0, %s521_s16  }
  0x45   :  { %s522_s18 = smov [#allocation10]   ;;  %s462_s24 = scalar_lea.hbm %s662_s4, 256 }
  0x46   :  { %s67_s19 = sshll.u32 %s522_s18, 4  ;;  %p463_p4 = scmp.ne.s32.totalorder %s662_s4, %s462_s24  ;;  %s68_s19 = int_to_ptr.vmem [resolvable:$true] %s67_s19 }
  0x47   :  { %p466_p5 = scmp.lt.u32.totalorder %s462_s24, %s662_s4 }
  0x49   :  { %p468_p6 = pnand %p466_p5, %p463_p4 }
  0x4b   :  { %471 = shalt.err (!%p468_p6)
}
  0x4c   :  { %s472_s29 = scalar_lea.vmem %s68_s19, 256  ;;  %p477_p8 = scmp.lt.s32.totalorder %s68_s19, %s68_s19 }
  0x4d   :  { %p473_p7 = scmp.ne.s32.totalorder %s68_s19, %s472_s29  ;;  %p478_p9 = scmp.lt.s32.totalorder %s472_s29, %s472_s29 }
  0x4f   :  { %p479_p10 = por %p478_p9, %p477_p8 }
  0x51   :  { %p480_p11 = pnand %p479_p10, %p473_p7 }
  0x53   :  { %483 = shalt.err (!%p480_p11)
}
  0x54   :  { %73 = dma.hbm_to_vmem [thread:$0]  %s662_s4, 256, %s68_s19, [#allocation9], %s516_s30, %s516_s30, %s517_s6  }
  0x55   :  { %506 = dma.done.wait [#allocation3], 256  }
  0x56   :  { %507 = vsyncadd [#allocation3], 4294967040 }
  0x57   :  { %508 = dma.done.wait [#allocation6], 768  }
  0x58   :  { %509 = vsyncadd [#allocation6], 4294966528 }
  0x59   :  { %510 = dma.done.wait [#allocation9], 512  }
  0x5a   :  { %511 = vsyncadd [#allocation9], 4294966784  ;;  %v358_v0 = vld [vmem:[#allocation10] sm:$0xff]   ;;  %v359_v1 = vld [vmem:[#allocation8] sm:$0xff]   ;;  %vm128_vm0 = vcmask 261120   ;;  %s523_s4 = smov [#allocation11]  }
  0x5b   :  { %328 = vmatprep.subr.bf16.mxu1 %v358_v0  ;;  %v360_v2 = vld [vmem:[#allocation10 + $0x8] sm:$0xff]   ;;  %336 = vmatprep.subr.bf16.mxu0 %v359_v1  ;;  %v361_v3 = vld [vmem:[#allocation8 + $0x8] sm:$0xff]   ;;  %v362_v4 = vld [vmem:[#allocation5] sm:$0xff]   ;;  %s294_s30 = sshll.u32 %s523_s4, 4  ;;  %s295_s30 = int_to_ptr.vmem [resolvable:$true] %s294_s30 }
  0x5c   :  { %329 = vmatpush3.bf16.msra.mxu1 %v358_v0  ;;  %337 = vmatpush3.bf16.msra.mxu0 %v359_v1  ;;  %v363_v5 = vld [vmem:[#allocation2] sm:$0xff]   ;;  %v364_v6 = vld [vmem:[#allocation5 + $0x8] sm:$0xff]   ;;  %v365_v7 = vld [vmem:[#allocation2 + $0x8] sm:$0xff]   ;;  %s484_s6 = scalar_lea.vmem %s295_s30, 512  ;;  %p489_p13 = scmp.lt.s32.totalorder %s295_s30, %s295_s30 }
  0x5d   :  { %330 = vmatprep.subr.bf16.mxu1 %v360_v2  ;;  %338 = vmatprep.subr.bf16.mxu0 %v361_v3  ;;  %v263_v10 = vld [vmem:[#allocation7 + $0x10] sm:$0xff]  ;;  %v261_v14 = vld [vmem:[#allocation7] sm:$0xff]  ;;  %v264_v18 = vld [vmem:[#allocation7 + $0x18] sm:$0xff]  ;;  %p485_p12 = scmp.ne.s32.totalorder %s295_s30, %s484_s6  ;;  %p490_p0 = scmp.lt.s32.totalorder %s484_s6, %s484_s6 }
  0x5e   :  { %332 = vmatprep.mubr.msk.bf16.mxu1 %vm128_vm0, %v362_v4  ;;  %340 = vmatprep.mubr.msk.bf16.mxu0 %vm128_vm0, %v363_v5  ;;  %v262_v23 = vld [vmem:[#allocation7 + $0x8] sm:$0xff] }
  0x5f   :  { %p491_p1 = por %p490_p0, %p489_p13 }
  0x60   :  { %331 = vmatpush3.bf16.msra.mxu1 %v360_v2  ;;  %339 = vmatpush3.bf16.msra.mxu0 %v361_v3 }
  0x61   :  { %p492_p2 = pnand %p491_p1, %p485_p12 }
  0x63   :  { %333 = vmatmul.mubr.msk.bf16.vlgmr.msra.gmra.mrb[0].mxu1 %vm128_vm0, %v364_v6  ;;  %341 = vmatmul.mubr.msk.bf16.vlgmr.msra.gmra.mrb[0].mxu0 %vm128_vm0, %v365_v7 }
 0x136   :  { %v334_v8 = vpop.f32.mrb[0].mxu1  ;;  %v342_v9 = vpop.f32.mrb[0].mxu0 }
 0x137   :  { %v169_v11 = vpop.f32.mrb[1].mxu1  ;;  %v255_v12 = vadd.f32 %v342_v9, %v334_v8  ;;  %v246_v13 = vpop.f32.mrb[1].mxu0 }
 0x138   :  { %v335_v15 = vpop.f32.mrb[2].mxu1  ;;  %v247_v16 = vadd.f32 %v246_v13, %v169_v11  ;;  %v343_v17 = vpop.f32.mrb[2].mxu0 }
 0x139   :  { %v172_v19 = vpop.f32.mrb[3].mxu1  ;;  %v267_v20 = vadd.f32 %v263_v10, %v255_v12  ;;  %v258_v21 = vadd.f32 %v343_v17, %v335_v15  ;;  %v249_v22 = vpop.f32.mrb[3].mxu0 }
 0x13a   :  { %v265_v24 = vadd.f32 %v261_v14, %v247_v16  ;;  %v250_v25 = vadd.f32 %v249_v22, %v172_v19 }
 0x13b   :  { %v271_v26 = vmul.f32 0.5, %v267_v20  ;;  %v268_v27 = vadd.f32 %v264_v18, %v258_v21 }
 0x13c   :  { %v269_v28 = vmul.f32 0.5, %v265_v24  ;;  %v266_v29 = vadd.f32 %v262_v23, %v250_v25 }
 0x13d   :  { %366 = vtanh.f32 %v271_v26  ;;  %v272_v30 = vmul.f32 0.5, %v268_v27 }
 0x13e   :  { %368 = vtanh.f32 %v269_v28  ;;  %v270_v31 = vmul.f32 0.5, %v266_v29 }
 0x13f   :  { %370 = vtanh.f32 %v272_v30 }
 0x140   :  { %372 = vtanh.f32 %v270_v31 }
 0x147   :  { %v367_v32 = vpop.eup %366 }
 0x148   :  { %v369_v33 = vpop.eup %368  ;;  %v279_v34 = vadd.f32 1.0, %v367_v32 }
 0x149   :  { %v371_v35 = vpop.eup %370  ;;  %v277_v36 = vadd.f32 1.0, %v369_v33 }
 0x14a   :  { %v373_v37 = vpop.eup %372  ;;  %v283_v38 = vmul.f32 0.5, %v279_v34  ;;  %v280_v39 = vadd.f32 1.0, %v371_v35 }
 0x14b   :  { %v281_v40 = vmul.f32 0.5, %v277_v36  ;;  %v278_v41 = vadd.f32 1.0, %v373_v37 }
 0x14c   :  { %287 = vst [vmem:[#allocation11 + $0x10] sm:$0xff] %v283_v38  ;;  %v284_v42 = vmul.f32 0.5, %v280_v39 }
 0x14d   :  { %285 = vst [vmem:[#allocation11] sm:$0xff] %v281_v40  ;;  %v282_v43 = vmul.f32 0.5, %v278_v41 }
 0x14e   :  { %288 = vst [vmem:[#allocation11 + $0x18] sm:$0xff] %v284_v42 }
 0x14f   :  { %286 = vst [vmem:[#allocation11 + $0x8] sm:$0xff] %v282_v43 }
 0x150   :  { %495 = shalt.err (!%p492_p2)
}
 0x151   :  { %s496_s7 = scalar_lea.hbm %s663_s5, 512 }
 0x152   :  { %p497_p3 = scmp.ne.s32.totalorder %s663_s5, %s496_s7  ;;  %p500_p4 = scmp.lt.u32.totalorder %s496_s7, %s663_s5 }
 0x154   :  { %p502_p5 = pnand %p500_p4, %p497_p3 }
 0x156   :  { %505 = shalt.err (!%p502_p5)
}
 0x157   :  { %300 = dma.vmem_to_hbm [thread:$0]  %s295_s30, 512, %s663_s5, [#allocation4], %s520_s0, %s520_s0, %s521_s16  }
 0x158   :  { %512 = dma.done.wait [#allocation4], 512  }
 0x159   :  { %513 = vsyncadd [#allocation4], 4294966784 }
 0x15a   :  { %304 = vsyncpa [#allocation3], 1 }
 0x15b   :  { %305 = vsyncpa [#allocation6], 1 }
 0x15c   :  { %306 = vsyncpa [#allocation9], 1 }
 0x15d   :  { %307 = vsyncpa [#allocation4], 1 }

</bundles_post_ra>
